<compile_context>
chip_gen: v6e
topology: v6e:2x2x1
jax: 0.10.0
libtpu: 0.0.40
codegen_flags: <defaults>
</compile_context>

<pallas_src>
import functools

import jax
import jax.numpy as jnp
from jax.experimental import pallas as pl
from jax.experimental.pallas import tpu as pltpu


def _round_up(x, m):
    return (x + m - 1) // m * m


def _block_loss(logits_raw, tgt, w, num_classes):
    """Per-element loss for one (TN, C) tile.

    No row masking: rows past the real batch only exist in the ragged last
    block and Pallas discards their writeback, so garbage there never lands in
    HBM and cannot contaminate valid rows (all math is row-independent)."""
    logits = logits_raw.astype(jnp.float32)  # f32 math in-kernel (required on v5e)
    tn, c = logits.shape

    # Numerically stable -log_softmax(logits)_ij == lse_i - logits_ij.
    m = jnp.max(logits, axis=-1, keepdims=True)                               # [TN,1]
    lse = m + jnp.log(jnp.sum(jnp.exp(logits - m), axis=-1, keepdims=True))   # [TN,1]

    # Categorical targets: one-hot(target) for target>=0 else uniform 1/C,
    # built via a lane-iota compare (no in-kernel relayout of targets).
    col = jax.lax.broadcasted_iota(jnp.int32, (tn, c), 1)                     # [TN,C]
    onehot = (col == tgt).astype(jnp.float32)                                 # tgt: [TN,1]
    t = jnp.where(tgt >= 0, onehot, 1.0 / num_classes)                        # [TN,C]

    loss = t * (lse - logits)
    if w is not None:          # specialized away entirely when weight is None
        loss = loss * w
    return loss


def _eos_rowsum_kernel(logits_ref, targets_ref, *rest, num_classes, has_weight):
    """mean/sum path: per-row partial losses; final tiny reduction in the wrapper."""
    if has_weight:
        weight_ref, out_ref = rest
        w = weight_ref[...]
    else:
        (out_ref,) = rest
        w = None
    loss = _block_loss(logits_ref[...], targets_ref[...], w, num_classes)
    out_ref[...] = jnp.sum(loss, axis=-1, keepdims=True)                      # [TN,1]


def _eos_elementwise_kernel(logits_ref, targets_ref, *rest, num_classes, has_weight):
    """reduction='none' path: full (TN, C) loss tile, written in out_ref.dtype."""
    if has_weight:
        weight_ref, out_ref = rest
        w = weight_ref[...]
    else:
        (out_ref,) = rest
        w = None
    loss = _block_loss(logits_ref[...], targets_ref[...], w, num_classes)
    out_ref[...] = loss.astype(out_ref.dtype)                                 # [TN,C]


def _choose_tn(n, c, in_itemsize, elem_out_itemsize=0):
    """Row-tile size selection.

    * big enough (~2 MiB logits tiles) to amortize per-grid-step pipeline
      overhead (matters for small C),
    * small enough that double-buffered tiles stay well under the 32 MiB default
      scoped VMEM on v6e/v7x (and 64 MiB physical VMEM on v7x),
    * capped so the grid keeps >= 2 row blocks when possible, so the "parallel"
      axis actually feeds both v7x TensorCores.
    """
    row_bytes = 2 * (c * in_itemsize + 4 + 4)       # logits + int32 targets + rowsum out (double-buffered)
    if elem_out_itemsize:
        row_bytes += 2 * c * elem_out_itemsize       # elementwise output tile (double-buffered)
    vmem_budget = 20 * 1024 * 1024                   # conservative: < 32 MiB default scoped VMEM
    tn_budget = max(8, (vmem_budget // row_bytes) // 8 * 8)
    tn_target = _round_up(max(8, pl.cdiv(2 * 1024 * 1024, c * in_itemsize)), 8)
    tn = min(tn_budget, tn_target, 8192)
    if n > 16:   # keep at least 2 blocks so both v7x TensorCores get work
        tn = min(tn, _round_up(pl.cdiv(n, 2), 8))
    tn = min(tn, _round_up(n, 8))
    # TODO(synk): for vocab-scale C where even an (8, C) tile blows the VMEM budget,
    # add a class-dim grid axis with an online LSE (running max/sum in (tn,1)
    # scratch, init/finalize via pl.when, C axis last and "arbitrary").
    return max(8, tn)


def entropic_open_set_loss(logits, targets, *, num_classes, reduction="mean",
                           weight=None):
    """logits: [N, C] float (streamed in native dtype, f32 math in-kernel),
    targets: [N] int (negative => unknown sample -> uniform target)."""
    n, c = logits.shape
    assert c == num_classes
    targets_2d = targets.astype(jnp.int32).reshape(n, 1)

    has_weight = weight is not None
    in_itemsize = jnp.dtype(logits.dtype).itemsize
    elementwise = reduction not in ("mean", "sum")
    out_dtype = logits.dtype if elementwise else jnp.float32
    tn = _choose_tn(n, c, in_itemsize,
                    jnp.dtype(out_dtype).itemsize if elementwise else 0)
    num_blocks = pl.cdiv(n, tn)

    operands = [logits, targets_2d]
    in_specs = [
        pl.BlockSpec((tn, c), lambda i: (i, 0)),   # logits row block (native dtype)
        pl.BlockSpec((tn, 1), lambda i: (i, 0)),   # targets row block (column vector)
    ]
    if has_weight:
        w = jnp.broadcast_to(jnp.asarray(weight, jnp.float32), (c,)).reshape(1, c)
        operands.append(w)
        in_specs.append(pl.BlockSpec((1, c), lambda i: (0, 0)))   # resident per-class weight

    cp = pltpu.CompilerParams(dimension_semantics=("parallel",))

    if not elementwise:   # 'mean' / 'sum'
        kernel = functools.partial(_eos_rowsum_kernel, num_classes=num_classes,
                                   has_weight=has_weight)
        row_losses = pl.pallas_call(
            kernel,
            out_shape=jax.ShapeDtypeStruct((n, 1), jnp.float32),
            grid=(num_blocks,),
            in_specs=in_specs,
            out_specs=pl.BlockSpec((tn, 1), lambda i: (i, 0)),
            compiler_params=cp,
        )(*operands)
        total = jnp.sum(row_losses)
        if reduction == "mean":
            return total / (n * c)
        return total
    else:                 # 'none'
        kernel = functools.partial(_eos_elementwise_kernel, num_classes=num_classes,
                                   has_weight=has_weight)
        return pl.pallas_call(
            kernel,
            out_shape=jax.ShapeDtypeStruct((n, c), out_dtype),
            grid=(num_blocks,),
            in_specs=in_specs,
            out_specs=pl.BlockSpec((tn, c), lambda i: (i, 0)),
            compiler_params=cp,
        )(*operands)


def _reference(logits, targets, num_classes, reduction="mean", weight=None):
    """Pure-JAX port of the PyTorch module for verification."""
    n, c = logits.shape
    logits = logits.astype(jnp.float32)
    onehot = jax.nn.one_hot(targets, c, dtype=jnp.float32)      # zeros for negatives
    uniform = jnp.full((n, c), 1.0 / num_classes, jnp.float32)
    cat = jnp.where((targets >= 0)[:, None], onehot, uniform)
    nll = -jax.nn.log_softmax(logits, axis=1)
    loss = nll * cat
    if weight is not None:
        loss = loss * jnp.asarray(weight, jnp.float32).reshape(1, c)
    if reduction == "mean":
        return loss.mean()
    if reduction == "sum":
        return loss.sum()
    return loss


if __name__ == "__main__":
    key = jax.random.PRNGKey(0)
    k1, k2, k3, k4 = jax.random.split(key, 4)

    NUM_CLASSES = 10
    N_FRAMES = 16
    logits = jax.random.normal(k1, (N_FRAMES, NUM_CLASSES), jnp.float32) * 3.0
    # targets in [-2, NUM_CLASSES): negative entries are "unknown" (entropic) samples
    targets = jax.random.randint(k2, (N_FRAMES,), -2, NUM_CLASSES, dtype=jnp.int32)

    for reduction in ("mean", "sum", "none"):
        out = entropic_open_set_loss(logits, targets, num_classes=NUM_CLASSES,
                                     reduction=reduction)
        out = jax.block_until_ready(out)
        ref = _reference(logits, targets, NUM_CLASSES, reduction=reduction)
        assert jnp.allclose(jnp.asarray(out, jnp.float32), ref, atol=1e-5, rtol=1e-5), \
            (reduction, out, ref)
        assert not jnp.any(jnp.isnan(jnp.asarray(out, jnp.float32)))

    # Multi-block grid + ragged last block + per-class weight.
    N_BIG = 300
    logits_b = jax.random.normal(k3, (N_BIG, NUM_CLASSES), jnp.float32)
    targets_b = jax.random.randint(k4, (N_BIG,), -3, NUM_CLASSES, dtype=jnp.int32)
    weight = jnp.linspace(0.5, 1.5, NUM_CLASSES, dtype=jnp.float32)
    for reduction in ("mean", "sum", "none"):
        out = entropic_open_set_loss(logits_b, targets_b, num_classes=NUM_CLASSES,
                                     reduction=reduction, weight=weight)
        out = jax.block_until_ready(out)
        ref = _reference(logits_b, targets_b, NUM_CLASSES, reduction=reduction,
                         weight=weight)
        assert jnp.allclose(jnp.asarray(out, jnp.float32), ref,
                            atol=1e-5, rtol=1e-5), (reduction,)

    # Native bf16 streaming path (math stays f32 in-kernel).
    logits_bf = logits_b.astype(jnp.bfloat16)
    out = entropic_open_set_loss(logits_bf, targets_b, num_classes=NUM_CLASSES,
                                 reduction="sum")
    out = jax.block_until_ready(out)
    ref = _reference(logits_bf.astype(jnp.float32), targets_b, NUM_CLASSES,
                     reduction="sum")
    assert jnp.allclose(out, ref, atol=1e-3, rtol=1e-3), (out, ref)

    print("KERNEL_OK")
</pallas_src>

<mosaic_0001>
module attributes {stable_mosaic.version = 11 : i64} {
  func.func @_eos_rowsum_kernel(%arg0: i32, %arg1: memref<16x10xf32, #tpu.memory_space<vmem>>, %arg2: memref<16x1xi32, #tpu.memory_space<vmem>>, %arg3: memref<16x1xf32, #tpu.memory_space<vmem>>) attributes {dimension_semantics = [#tpu.dimension_semantics<parallel>], iteration_bounds = array<i64: 1>, scalar_prefetch = 0 : i64, scratch_operands = 0 : i64, tpu.core_type = #tpu.core_type<tc>, window_params = [{transform_indices = @transform_0, window_bounds = array<i64: 16, 10>}, {transform_indices = @transform_1, window_bounds = array<i64: 16, 1>}, {transform_indices = @transform_2, window_bounds = array<i64: 16, 1>}]} {
    %c0 = arith.constant 0 : index
    %c0_0 = arith.constant 0 : index
    %0 = vector.load %arg1[%c0, %c0_0] : memref<16x10xf32, #tpu.memory_space<vmem>>, vector<16x10xf32>
    %c0_1 = arith.constant 0 : index
    %c0_2 = arith.constant 0 : index
    %1 = vector.load %arg2[%c0_1, %c0_2] : memref<16x1xi32, #tpu.memory_space<vmem>>, vector<16x1xi32>
    %cst = arith.constant dense<0xFF800000> : vector<16xf32>
    %2 = vector.multi_reduction <maximumf>, %0, %cst [1] : vector<16x10xf32> to vector<16xf32>
    %3 = vector.shape_cast %2 : vector<16xf32> to vector<16x1xf32>
    %4 = vector.broadcast %3 : vector<16x1xf32> to vector<16x10xf32>
    %5 = arith.subf %0, %4 : vector<16x10xf32>
    %6 = math.exp %5 : vector<16x10xf32>
    %cst_3 = arith.constant dense<0.000000e+00> : vector<16xf32>
    %7 = vector.multi_reduction <add>, %6, %cst_3 [1] : vector<16x10xf32> to vector<16xf32>
    %8 = vector.shape_cast %7 : vector<16xf32> to vector<16x1xf32>
    %9 = math.log %8 : vector<16x1xf32>
    %10 = arith.addf %3, %9 : vector<16x1xf32>
    %11 = tpu.iota {dimensions = array<i32: 1>} : vector<16x10xi32>
    %12 = vector.broadcast %1 : vector<16x1xi32> to vector<16x10xi32>
    %13 = arith.cmpi eq, %11, %12 : vector<16x10xi32>
    %14 = arith.extui %13 : vector<16x10xi1> to vector<16x10xi32>
    %15 = arith.sitofp %14 : vector<16x10xi32> to vector<16x10xf32>
    %c0_i32 = arith.constant 0 : i32
    %16 = vector.broadcast %c0_i32 : i32 to vector<16x1xi32>
    %17 = arith.cmpi sge, %1, %16 : vector<16x1xi32>
    %cst_4 = arith.constant 1.000000e-01 : f32
    %18 = vector.shape_cast %17 : vector<16x1xi1> to vector<16x1xi1>
    %19 = vector.broadcast %18 : vector<16x1xi1> to vector<16x10xi1>
    %20 = vector.broadcast %cst_4 : f32 to vector<16x10xf32>
    %21 = arith.select %19, %15, %20 : vector<16x10xi1>, vector<16x10xf32>
    %22 = vector.broadcast %10 : vector<16x1xf32> to vector<16x10xf32>
    %23 = arith.subf %22, %0 : vector<16x10xf32>
    %24 = arith.mulf %21, %23 : vector<16x10xf32>
    %cst_5 = arith.constant dense<0.000000e+00> : vector<16xf32>
    %25 = vector.multi_reduction <add>, %24, %cst_5 [1] : vector<16x10xf32> to vector<16xf32>
    %26 = vector.shape_cast %25 : vector<16xf32> to vector<16x1xf32>
    %c0_6 = arith.constant 0 : index
    %c0_7 = arith.constant 0 : index
    %27 = vector.load %arg3[%c0_6, %c0_7] : memref<16x1xf32, #tpu.memory_space<vmem>>, vector<16x1xf32>
    tpu.vector_store %arg3[%c0_6, %c0_7], %26 {strides = array<i32>} : memref<16x1xf32, #tpu.memory_space<vmem>>, vector<16x1xf32>,
    return
  }
  func.func @transform_0(%arg0: i32) -> (i32, i32) {
    %c0_i32 = arith.constant 0 : i32
    %c0_i32_0 = arith.constant 0 : i32
    return %arg0, %c0_i32 : i32, i32
  }
  func.func @transform_1(%arg0: i32) -> (i32, i32) {
    %c0_i32 = arith.constant 0 : i32
    %c0_i32_0 = arith.constant 0 : i32
    return %arg0, %c0_i32 : i32, i32
  }
  func.func @transform_2(%arg0: i32) -> (i32, i32) {
    %c0_i32 = arith.constant 0 : i32
    %c0_i32_0 = arith.constant 0 : i32
    return %arg0, %c0_i32 : i32, i32
  }
}

</mosaic_0001>

<bundles_post_ra>
// kernel: tpu_custom_call.1
= control target key start
LH: loop header
LB: loop body
LE: loop exit
PB: predicated region body
PF: predicated region fallthrough
CT: control target
= control target key end

     0   :  { %vm15_vm0 = vcmask 80896   ;;  %v99_v2 = vmov 0   ;;  %v40_v23 = vlaneseq  ;;  %v100_v28 = vmov 0.0   ;;  %s145_s0 = inlined_call_operand.vmem [shape: f32[16,10], index: 0, kind: input, shape index: {}]   ;;  %s146_s1 = inlined_call_operand.vmem [shape: s32[16,1], index: 1, kind: input, shape index: {}]   ;;  %s147_s2 = inlined_call_operand.vmem [shape: f32[16,1], index: 2, kind: output, shape index: {}]  }
   0x1   :  { %v11_v0 = vld [vmem:[%s145_s0] sm:$0xff]  ;;  %v122_v1 = vld [vmem:[%s145_s0 + $0x8] sm:$0xff]  ;;  %90 = vset.pattern.permute.xlu1 %v99_v2  ;;  %89 = vset.pattern.permute.xlu0 %v99_v2  ;;  %vm78_vm7 = vcmask 7168  }
   0x2   :  { %v14_v3 = vld [vmem:[%s146_s1 + $0x8] sm:$0xff]  ;;  %v16_v4 = vsel %vm15_vm0, %v11_v0, -inf  ;;  %v13_v5 = vld [vmem:[%s146_s1] sm:$0xff]  ;;  %v19_v6 = vsel %vm15_vm0, %v122_v1, -inf  ;;  %v41_v24 = vand.u32 127, %v40_v23 }
   0x3   :  { %46 = vperm.xlu1 %90, %v14_v3   ;;  %17 = vmax.xlane.f32.xlu0 %v16_v4  ;;  %vm54_vm1 = vcmp.ge.s32.totalorder %v13_v5, 0  ;;  %vm55_vm2 = vcmp.ge.s32.totalorder %v14_v3, 0 }
   0x4   :  { %v56_v7 = vsel %vm54_vm1, 1, %v99_v2  ;;  %v57_v8 = vsel %vm55_vm2, 1, %v99_v2 }
   0x7   :  { %59 = vperm.xlu1 %90, %v56_v7   ;;  %20 = vmax.xlane.f32.xlu0 %v19_v6 }
  0x1d   :  { %43 = vperm.xlu0 %89, %v13_v5  }
  0x7e   :  { %v47_v19 = vpop.permute.xlu1 %46 }
  0x7f   :  { %vm49_vm5 = vcmp.eq.s32.totalorder %v41_v24, %v47_v19 }
  0x80   :  { %v86_v38 = vsel %vm49_vm5, 1.0, %v100_v28 }
  0x82   :  { %v60_v20 = vpop.permute.xlu1 %59 }
  0x83   :  { %vm64_vm4 = vcmp.eq.s32.totalorder %v60_v20, 1 }
  0x8c   :  { %v18_v9 = vpop.xlane.xlu0 %17 }
  0x8d   :  { %v22_v10 = vsub.f32 %v11_v0, %v18_v9 }
  0x8f   :  { %v24_v11 = vmul.f32 1.442695, %v22_v10 }
  0x90   :  { %v21_v12 = vpop.xlane.xlu0 %20 }
  0x91   :  { %91 = vpow2.f32 %v24_v11  ;;  %v23_v13 = vsub.f32 %v122_v1, %v21_v12 }
  0x93   :  { %v26_v14 = vmul.f32 1.442695, %v23_v13 }
  0x95   :  { %93 = vpow2.f32 %v26_v14 }
  0x98   :  { %v44_v25 = vpop.permute.xlu0 %43 }
  0x99   :  { %vm48_vm3 = vcmp.eq.s32.totalorder %v41_v24, %v44_v25 }
  0x9a   :  { %v85_v29 = vsel %vm48_vm3, 1.0, %v100_v28 }
  0x9b   :  { %v66_v35 = vsel %vm64_vm4, %v85_v29, 0.1 }
  0x9e   :  { %v92_v15 = vpop.eup %91 }
  0x9f   :  { %v28_v16 = vsel %vm15_vm0, %v92_v15, 0.0 }
  0xa0   :  { %29 = vadd.xlane.f32.xlu1 %v28_v16 }
  0xa2   :  { %v94_v17 = vpop.eup %93 }
  0xa3   :  { %v31_v18 = vsel %vm15_vm0, %v94_v17, 0.0 }
  0xa4   :  { %32 = vadd.xlane.f32.xlu1 %v31_v18 }
  0xb5   :  { %62 = vperm.xlu1 %90, %v57_v8  }
 0x129   :  { %v30_v21 = vpop.xlane.xlu1 %29 }
 0x12a   :  { %95 = vlog2.f32 %v30_v21 }
 0x12d   :  { %v33_v22 = vpop.xlane.xlu1 %32 }
 0x12e   :  { %97 = vlog2.f32 %v33_v22 }
 0x131   :  { %v63_v32 = vpop.permute.xlu1 %62 }
 0x132   :  { %vm65_vm6 = vcmp.eq.s32.totalorder %v63_v32, 1 }
 0x133   :  { %v67_v41 = vsel %vm65_vm6, %v86_v38, 0.1 }
 0x137   :  { %v96_v26 = vpop.eup %95 }
 0x138   :  { %v35_v27 = vmul.f32 0.6931472, %v96_v26 }
 0x13a   :  { %v38_v30 = vadd.f32 %v35_v27, %v18_v9 }
 0x13b   :  { %v98_v31 = vpop.eup %97 }
 0x13c   :  { %v37_v33 = vmul.f32 0.6931472, %v98_v31  ;;  %v68_v34 = vsub.f32 %v38_v30, %v11_v0 }
 0x13e   :  { %v39_v36 = vadd.f32 %v37_v33, %v21_v12  ;;  %v70_v37 = vmul.f32 %v68_v34, %v66_v35 }
 0x140   :  { %v72_v39 = vsel %vm15_vm0, %v70_v37, 0.0  ;;  %v69_v40 = vsub.f32 %v39_v36, %v122_v1 }
 0x141   :  { %73 = vadd.xlane.f32.xlu1 %v72_v39 }
 0x142   :  { %v71_v42 = vmul.f32 %v69_v40, %v67_v41 }
 0x144   :  { %v75_v43 = vsel %vm15_vm0, %v71_v42, 0.0 }
 0x145   :  { %76 = vadd.xlane.f32.xlu0 %v75_v43 }
 0x1ca   :  { %v74_v44 = vpop.xlane.xlu1 %73 }
 0x1cb   :  { %79 = vst.msk [vmem:[%s147_s2] sm:$0xff] %vm78_vm7, %v74_v44 }
 0x1ce   :  { %v77_v45 = vpop.xlane.xlu0 %76 }
 0x1cf   :  { %80 = vst.msk [vmem:[%s147_s2 + $0x8] sm:$0xff] %vm78_vm7, %v77_v45 }

</bundles_post_ra>
